<compile_context>
chip_gen: v7x
topology: tpu7x:2x2x1
jax: 0.10.0
libtpu: 0.0.40
codegen_flags: <defaults>
</compile_context>

<pallas_src>
import functools

import jax
import jax.numpy as jnp
from jax.experimental import pallas as pl
from jax.experimental.pallas import tpu as pltpu

_LANE = 128
_SUBLANE = 8
_NUM_CORES = 2                        # leading "parallel" grid axis: splits across v7x's 2 TCs, no-op on v5e/v6e
_MAX_TILE_ROWS = 4096                 # hard cap on rows per input tile
_VMEM_INPUT_BUDGET = 8 * 1024 * 1024  # bytes for double-buffered input tiles (2*T inputs x 2 buffers)
_VMEM_LIMIT_BYTES = 32 * 1024 * 1024  # raise v5e's 16 MiB default scoped VMEM; safe on all generations
_PAD_LOGIT = 100.0                    # sigmoid(100)==1 and softplus(100)==100 exactly in fp32 -> BCE pad term is 0


def _round_up(x, m):
    return ((x + m - 1) // m) * m


def _bce_sum_kernel(*refs, num_tasks, rows, tile_rows, tiles_per_core,
                    needs_mask, compute_dtype):
    """Accumulate per-task sums of BCE(sigmoid(stu), sigmoid(tea)) into (1, T, 8, 128) lane partials."""
    stu_refs = refs[:num_tasks]
    tea_refs = refs[num_tasks:2 * num_tasks]
    out_ref = refs[2 * num_tasks]

    c = pl.program_id(0)              # core-split axis
    r = pl.program_id(1)              # row-tile axis (reduction)

    @pl.when(r == 0)
    def _():
        out_ref[...] = jnp.zeros_like(out_ref)

    if needs_mask:
        # Rows of this tile that are real data (<=0 for a fully redundant tile, >=tile_rows for full tiles).
        valid_rows = rows - (c * tiles_per_core + r) * tile_rows
        row_ids = jax.lax.broadcasted_iota(jnp.int32, (tile_rows, _LANE), 0)
        mask = row_ids < valid_rows

    parts = []
    for i in range(num_tasks):        # static unroll over tasks
        x = stu_refs[i][...].astype(compute_dtype)        # student logits (tile_rows, 128)
        y = tea_refs[i][...].astype(compute_dtype)        # teacher logits
        t = 0.5 * jnp.tanh(0.5 * y) + 0.5                 # sigmoid via tanh: 1 EUP op
        xc = jnp.clip(x, -100.0, 100.0)                   # reproduces torch's -100 log clamp
        bce = (jax.nn.softplus(xc) - t * xc).astype(jnp.float32)
        if needs_mask:
            bce = jnp.where(mask, bce, 0.0)
        # VALU-only partial reduction to one (8, 128) vreg; cross-lane reduce happens once in the wrapper.
        parts.append(bce.reshape(-1, _SUBLANE, _LANE).sum(axis=0))

    out_ref[...] += jnp.stack(parts)[None]                # (1, T, 8, 128)


def _lane_dense(hm):
    """(B, C, H, W) -> (rows, 128) with rows a multiple of 8.

    Free metadata reshape (no HBM copy) when size % 1024 == 0 — the common case for real heatmaps.
    Otherwise pad the ragged tail with zero-BCE logits (one HBM copy; rare)."""
    flat = hm.reshape(-1)
    n = flat.shape[0]
    padded = _round_up(n, _LANE * _SUBLANE)
    if padded != n:
        flat = jnp.concatenate(
            [flat, jnp.full((padded - n,), _PAD_LOGIT, dtype=flat.dtype)])
    return flat.reshape(-1, _LANE)


def _bce_sums(stu_list, tea_list, compute_dtype=jnp.float32):
    """Per-task sum of element-wise BCE; all tasks of one shape group fused in a single pipelined call."""
    num_tasks = len(stu_list)
    stu2d = [_lane_dense(h) for h in stu_list]
    tea2d = [_lane_dense(h) for h in tea_list]
    rows = stu2d[0].shape[0]                              # multiple of 8, >= 8

    itemsize = max(h.dtype.itemsize for h in stu2d + tea2d)
    rows_budget = _VMEM_INPUT_BUDGET // (2 * 2 * num_tasks * _LANE * itemsize)
    rows_budget = max(_SUBLANE, (rows_budget // _SUBLANE) * _SUBLANE)
    tile_rows = min(_MAX_TILE_ROWS, rows_budget, rows)

    n_tiles = pl.cdiv(rows, tile_rows)
    tiles_per_core = pl.cdiv(n_tiles, _NUM_CORES)
    needs_mask = (_NUM_CORES * tiles_per_core * tile_rows != rows)

    def in_map(c, r):
        # Clamp so a core's trailing (redundant) tile re-reads the last real block; kernel masks it to 0.
        return (jnp.minimum(c * tiles_per_core + r, n_tiles - 1), 0)

    kernel = functools.partial(
        _bce_sum_kernel, num_tasks=num_tasks, rows=rows, tile_rows=tile_rows,
        tiles_per_core=tiles_per_core, needs_mask=needs_mask,
        compute_dtype=compute_dtype)

    partials = pl.pallas_call(
        kernel,
        out_shape=jax.ShapeDtypeStruct(
            (_NUM_CORES, num_tasks, _SUBLANE, _LANE), jnp.float32),
        grid=(_NUM_CORES, tiles_per_core),
        in_specs=[pl.BlockSpec((tile_rows, _LANE), in_map)
                  for _ in range(2 * num_tasks)],
        out_specs=pl.BlockSpec((1, num_tasks, _SUBLANE, _LANE),
                               lambda c, r: (c, 0, 0, 0)),
        compiler_params=pltpu.CompilerParams(
            dimension_semantics=("parallel", "arbitrary"),
            vmem_limit_bytes=_VMEM_LIMIT_BYTES),
    )(*stu2d, *tea2d)

    return jnp.sum(partials, axis=(0, 2, 3))              # (T,)


def heatmap_aug_loss(stu_pred, tea_pred, fg_map, compute_dtype=jnp.float32):
    """JAX/Pallas equivalent of HeatMapAug.forward.

    stu_pred / tea_pred: list (per task) of heatmap logits, each (B, C, H, W).
    fg_map: (B, H, W) foreground mask.
    compute_dtype: dtype for the in-kernel transcendentals. jnp.bfloat16 is ~1.5-2x faster on v6e/v7x
      (bf16 EUP) but slightly changes numerics; keep jnp.float32 on v5e. Accumulation is always fp32.
    """
    # fg_map only rescales a scalar; one plain-JAX sum keeps torch's 0/0-NaN behaviour.
    fg_sum = jnp.sum(fg_map.astype(jnp.float32))

    num_task = len(stu_pred)
    counts = jnp.asarray([h.size for h in stu_pred], jnp.float32)

    # Group tasks by flattened size so same-resolution tasks share one fused, pipelined pallas_call.
    groups = {}
    for idx, h in enumerate(stu_pred):
        groups.setdefault(h.size, []).append(idx)

    bce_sums = [None] * num_task
    for idxs in groups.values():
        sums = _bce_sums([stu_pred[i] for i in idxs],
                         [tea_pred[i] for i in idxs],
                         compute_dtype=compute_dtype)
        for j, i in enumerate(idxs):
            bce_sums[i] = sums[j]
    bce_sums = jnp.stack(bce_sums)

    task_mean_bce = bce_sums / counts
    # Faithful to: torch.sum(scalar_bce * fg_map) / torch.sum(fg_map)
    task_kl = (task_mean_bce * fg_sum) / fg_sum
    return jnp.sum(task_kl)


def _reference_loss(stu_pred, tea_pred, fg_map):
    """Pure-JAX reference (direct sigmoid + clamped-log form, matching torch)."""
    fg_sum = jnp.sum(fg_map.astype(jnp.float32))
    kl_loss = jnp.float32(0.0)
    for stu_hm, tea_hm in zip(stu_pred, tea_pred):
        s = jax.nn.sigmoid(stu_hm.astype(jnp.float32))
        t = jax.nn.sigmoid(tea_hm.astype(jnp.float32))
        log_s = jnp.maximum(jnp.log(s), -100.0)
        log_1ms = jnp.maximum(jnp.log(1.0 - s), -100.0)
        bce = -(t * log_s + (1.0 - t) * log_1ms)
        kl_loss = kl_loss + (jnp.mean(bce) * fg_sum) / fg_sum
    return kl_loss


if __name__ == "__main__":
    key = jax.random.PRNGKey(0)

    # --- main path: two same-shape tasks, size % 1024 == 0 (free reshape, no HBM copy) ---
    num_task = 2
    B, C, H, W = 2, 4, 16, 16
    keys = jax.random.split(key, 2 * num_task + 1)
    stu_pred = [jax.random.normal(keys[i], (B, C, H, W), dtype=jnp.float32)
                for i in range(num_task)]
    tea_pred = [jax.random.normal(keys[num_task + i], (B, C, H, W), dtype=jnp.float32)
                for i in range(num_task)]
    fg_map = (jax.random.uniform(keys[-1], (B, H, W)) > 0.5).astype(jnp.float32)

    loss = jax.block_until_ready(heatmap_aug_loss(stu_pred, tea_pred, fg_map))
    ref = _reference_loss(stu_pred, tea_pred, fg_map)
    assert jnp.allclose(loss, ref, rtol=1e-5, atol=1e-5), (loss, ref)

    # --- fallback paths: tasks with differing shapes (shape-grouped calls) + ragged in-kernel mask ---
    keys2 = jax.random.split(jax.random.PRNGKey(1), 4)
    stu_b = [jax.random.normal(keys2[0], (2, 2, 16, 16), dtype=jnp.float32),
             jax.random.normal(keys2[1], (2, 2, 12, 12), dtype=jnp.float32)]
    tea_b = [jax.random.normal(keys2[2], (2, 2, 16, 16), dtype=jnp.float32),
             jax.random.normal(keys2[3], (2, 2, 12, 12), dtype=jnp.float32)]
    loss_b = jax.block_until_ready(heatmap_aug_loss(stu_b, tea_b, fg_map))
    ref_b = _reference_loss(stu_b, tea_b, fg_map)
    assert jnp.allclose(loss_b, ref_b, rtol=1e-5, atol=1e-5), (loss_b, ref_b)

    print("KERNEL_OK")
</pallas_src>

<mosaic_0001>
module attributes {stable_mosaic.version = 11 : i64} {
  func.func @_bce_sum_kernel(%arg0: i32, %arg1: i32, %arg2: memref<16x128xf32, #tpu.memory_space<vmem>>, %arg3: memref<16x128xf32, #tpu.memory_space<vmem>>, %arg4: memref<16x128xf32, #tpu.memory_space<vmem>>, %arg5: memref<16x128xf32, #tpu.memory_space<vmem>>, %arg6: memref<1x2x8x128xf32, #tpu.memory_space<vmem>>) attributes {dimension_semantics = [#tpu.dimension_semantics<parallel>, #tpu.dimension_semantics<arbitrary>], iteration_bounds = array<i64: 2, 1>, scalar_prefetch = 0 : i64, scratch_operands = 0 : i64, tpu.core_type = #tpu.core_type<tc>, window_params = [{transform_indices = @transform_0, window_bounds = array<i64: 16, 128>}, {transform_indices = @transform_1, window_bounds = array<i64: 16, 128>}, {transform_indices = @transform_2, window_bounds = array<i64: 16, 128>}, {transform_indices = @transform_3, window_bounds = array<i64: 16, 128>}, {transform_indices = @transform_4, window_bounds = array<i64: 1, 2, 8, 128>}]} {
    %c0_i32 = arith.constant 0 : i32
    %0 = arith.cmpi eq, %arg1, %c0_i32 : i32
    %1 = arith.extui %0 : i1 to i32
    %c0_i32_0 = arith.constant 0 : i32
    %2 = arith.cmpi ne, %1, %c0_i32_0 : i32
    scf.if %2 {
      %cst_34 = arith.constant 0.000000e+00 : f32
      %83 = vector.broadcast %cst_34 : f32 to vector<1x2x8x128xf32>
      %c0_35 = arith.constant 0 : index
      %c0_36 = arith.constant 0 : index
      %c0_37 = arith.constant 0 : index
      %c0_38 = arith.constant 0 : index
      %84 = vector.load %arg6[%c0_35, %c0_36, %c0_37, %c0_38] : memref<1x2x8x128xf32, #tpu.memory_space<vmem>>, vector<1x2x8x128xf32>
      tpu.vector_store %arg6[%c0_35, %c0_36, %c0_37, %c0_38], %83 {strides = array<i32>} : memref<1x2x8x128xf32, #tpu.memory_space<vmem>>, vector<1x2x8x128xf32>,
    } else {
    }
    %c1_i32 = arith.constant 1 : i32
    %3 = arith.muli %arg0, %c1_i32 : i32
    %4 = arith.addi %3, %arg1 : i32
    %c16_i32 = arith.constant 16 : i32
    %5 = arith.muli %4, %c16_i32 : i32
    %c16_i32_1 = arith.constant 16 : i32
    %6 = arith.subi %c16_i32_1, %5 : i32
    %7 = tpu.iota {dimensions = array<i32: 0>} : vector<16x128xi32>
    %8 = vector.broadcast %6 : i32 to vector<16x128xi32>
    %9 = arith.cmpi slt, %7, %8 : vector<16x128xi32>
    %c0 = arith.constant 0 : index
    %c0_2 = arith.constant 0 : index
    %10 = vector.load %arg2[%c0, %c0_2] : memref<16x128xf32, #tpu.memory_space<vmem>>, vector<16x128xf32>
    %c0_3 = arith.constant 0 : index
    %c0_4 = arith.constant 0 : index
    %11 = vector.load %arg4[%c0_3, %c0_4] : memref<16x128xf32, #tpu.memory_space<vmem>>, vector<16x128xf32>
    %cst = arith.constant 5.000000e-01 : f32
    %12 = vector.broadcast %cst : f32 to vector<16x128xf32>
    %13 = arith.mulf %12, %11 : vector<16x128xf32>
    %14 = math.tanh %13 : vector<16x128xf32>
    %cst_5 = arith.constant 5.000000e-01 : f32
    %15 = vector.broadcast %cst_5 : f32 to vector<16x128xf32>
    %16 = arith.mulf %15, %14 : vector<16x128xf32>
    %cst_6 = arith.constant 5.000000e-01 : f32
    %17 = vector.broadcast %cst_6 : f32 to vector<16x128xf32>
    %18 = arith.addf %16, %17 : vector<16x128xf32>
    %cst_7 = arith.constant -1.000000e+02 : f32
    %cst_8 = arith.constant 1.000000e+02 : f32
    %19 = vector.broadcast %cst_7 : f32 to vector<16x128xf32>
    %20 = arith.maximumf %19, %10 : vector<16x128xf32>
    %21 = vector.broadcast %cst_8 : f32 to vector<16x128xf32>
    %22 = arith.minimumf %21, %20 : vector<16x128xf32>
    %cst_9 = arith.constant 0.000000e+00 : f32
    %23 = vector.broadcast %cst_9 : f32 to vector<16x128xf32>
    %24 = arith.maximumf %22, %23 : vector<16x128xf32>
    %25 = vector.broadcast %cst_9 : f32 to vector<16x128xf32>
    %26 = arith.subf %22, %25 : vector<16x128xf32>
    %27 = arith.cmpf one, %26, %26 : vector<16x128xf32>
    %28 = vector.broadcast %cst_9 : f32 to vector<16x128xf32>
    %29 = arith.addf %22, %28 : vector<16x128xf32>
    %30 = math.absf %26 : vector<16x128xf32>
    %cst_10 = arith.constant 0.000000e+00 : f32
    %31 = vector.broadcast %cst_10 : f32 to vector<16x128xf32>
    %32 = arith.subf %31, %30 : vector<16x128xf32>
    %33 = math.exp %32 : vector<16x128xf32>
    %34 = math.log1p %33 : vector<16x128xf32>
    %35 = arith.addf %24, %34 : vector<16x128xf32>
    %36 = arith.select %27, %29, %35 : vector<16x128xi1>, vector<16x128xf32>
    %37 = arith.mulf %18, %22 : vector<16x128xf32>
    %38 = arith.subf %36, %37 : vector<16x128xf32>
    %cst_11 = arith.constant 0.000000e+00 : f32
    %39 = vector.broadcast %cst_11 : f32 to vector<16x128xf32>
    %40 = arith.select %9, %38, %39 : vector<16x128xi1>, vector<16x128xf32>
    %41 = vector.shape_cast %40 : vector<16x128xf32> to vector<2x8x128xf32>
    %cst_12 = arith.constant dense<0.000000e+00> : vector<8x128xf32>
    %42 = vector.multi_reduction <add>, %41, %cst_12 [0] : vector<2x8x128xf32> to vector<8x128xf32>
    %c0_13 = arith.constant 0 : index
    %c0_14 = arith.constant 0 : index
    %43 = vector.load %arg3[%c0_13, %c0_14] : memref<16x128xf32, #tpu.memory_space<vmem>>, vector<16x128xf32>
    %c0_15 = arith.constant 0 : index
    %c0_16 = arith.constant 0 : index
    %44 = vector.load %arg5[%c0_15, %c0_16] : memref<16x128xf32, #tpu.memory_space<vmem>>, vector<16x128xf32>
    %cst_17 = arith.constant 5.000000e-01 : f32
    %45 = vector.broadcast %cst_17 : f32 to vector<16x128xf32>
    %46 = arith.mulf %45, %44 : vector<16x128xf32>
    %47 = math.tanh %46 : vector<16x128xf32>
    %cst_18 = arith.constant 5.000000e-01 : f32
    %48 = vector.broadcast %cst_18 : f32 to vector<16x128xf32>
    %49 = arith.mulf %48, %47 : vector<16x128xf32>
    %cst_19 = arith.constant 5.000000e-01 : f32
    %50 = vector.broadcast %cst_19 : f32 to vector<16x128xf32>
    %51 = arith.addf %49, %50 : vector<16x128xf32>
    %cst_20 = arith.constant -1.000000e+02 : f32
    %cst_21 = arith.constant 1.000000e+02 : f32
    %52 = vector.broadcast %cst_20 : f32 to vector<16x128xf32>
    %53 = arith.maximumf %52, %43 : vector<16x128xf32>
    %54 = vector.broadcast %cst_21 : f32 to vector<16x128xf32>
    %55 = arith.minimumf %54, %53 : vector<16x128xf32>
    %cst_22 = arith.constant 0.000000e+00 : f32
    %56 = vector.broadcast %cst_22 : f32 to vector<16x128xf32>
    %57 = arith.maximumf %55, %56 : vector<16x128xf32>
    %58 = vector.broadcast %cst_22 : f32 to vector<16x128xf32>
    %59 = arith.subf %55, %58 : vector<16x128xf32>
    %60 = arith.cmpf one, %59, %59 : vector<16x128xf32>
    %61 = vector.broadcast %cst_22 : f32 to vector<16x128xf32>
    %62 = arith.addf %55, %61 : vector<16x128xf32>
    %63 = math.absf %59 : vector<16x128xf32>
    %cst_23 = arith.constant 0.000000e+00 : f32
    %64 = vector.broadcast %cst_23 : f32 to vector<16x128xf32>
    %65 = arith.subf %64, %63 : vector<16x128xf32>
    %66 = math.exp %65 : vector<16x128xf32>
    %67 = math.log1p %66 : vector<16x128xf32>
    %68 = arith.addf %57, %67 : vector<16x128xf32>
    %69 = arith.select %60, %62, %68 : vector<16x128xi1>, vector<16x128xf32>
    %70 = arith.mulf %51, %55 : vector<16x128xf32>
    %71 = arith.subf %69, %70 : vector<16x128xf32>
    %cst_24 = arith.constant 0.000000e+00 : f32
    %72 = vector.broadcast %cst_24 : f32 to vector<16x128xf32>
    %73 = arith.select %9, %71, %72 : vector<16x128xi1>, vector<16x128xf32>
    %74 = vector.shape_cast %73 : vector<16x128xf32> to vector<2x8x128xf32>
    %cst_25 = arith.constant dense<0.000000e+00> : vector<8x128xf32>
    %75 = vector.multi_reduction <add>, %74, %cst_25 [0] : vector<2x8x128xf32> to vector<8x128xf32>
    %c0_26 = arith.constant 0 : index
    %c0_27 = arith.constant 0 : index
    %c0_28 = arith.constant 0 : index
    %c0_29 = arith.constant 0 : index
    %76 = vector.load %arg6[%c0_26, %c0_27, %c0_28, %c0_29] : memref<1x2x8x128xf32, #tpu.memory_space<vmem>>, vector<1x2x8x128xf32>
    %77 = vector.shape_cast %42 : vector<8x128xf32> to vector<1x8x128xf32>
    %78 = vector.shape_cast %75 : vector<8x128xf32> to vector<1x8x128xf32>
    %79 = tpu.concatenate %77, %78 in 0 : vector<1x8x128xf32>, vector<1x8x128xf32> -> vector<2x8x128xf32>
    %80 = vector.shape_cast %79 : vector<2x8x128xf32> to vector<1x2x8x128xf32>
    %81 = arith.addf %76, %80 : vector<1x2x8x128xf32>
    %c0_30 = arith.constant 0 : index
    %c0_31 = arith.constant 0 : index
    %c0_32 = arith.constant 0 : index
    %c0_33 = arith.constant 0 : index
    %82 = vector.load %arg6[%c0_30, %c0_31, %c0_32, %c0_33] : memref<1x2x8x128xf32, #tpu.memory_space<vmem>>, vector<1x2x8x128xf32>
    tpu.vector_store %arg6[%c0_30, %c0_31, %c0_32, %c0_33], %81 {strides = array<i32>} : memref<1x2x8x128xf32, #tpu.memory_space<vmem>>, vector<1x2x8x128xf32>,
    return
  }
  func.func @transform_0(%arg0: i32, %arg1: i32) -> (i32, i32) {
    %c1_i32 = arith.constant 1 : i32
    %0 = arith.muli %arg0, %c1_i32 : i32
    %1 = arith.addi %0, %arg1 : i32
    %c0_i32 = arith.constant 0 : i32
    %2 = arith.minsi %1, %c0_i32 : i32
    %c0_i32_0 = arith.constant 0 : i32
    %c0_i32_1 = arith.constant 0 : i32
    return %2, %c0_i32_0 : i32, i32
  }
  func.func @transform_1(%arg0: i32, %arg1: i32) -> (i32, i32) {
    %c1_i32 = arith.constant 1 : i32
    %0 = arith.muli %arg0, %c1_i32 : i32
    %1 = arith.addi %0, %arg1 : i32
    %c0_i32 = arith.constant 0 : i32
    %2 = arith.minsi %1, %c0_i32 : i32
    %c0_i32_0 = arith.constant 0 : i32
    %c0_i32_1 = arith.constant 0 : i32
    return %2, %c0_i32_0 : i32, i32
  }
  func.func @transform_2(%arg0: i32, %arg1: i32) -> (i32, i32) {
    %c1_i32 = arith.constant 1 : i32
    %0 = arith.muli %arg0, %c1_i32 : i32
    %1 = arith.addi %0, %arg1 : i32
    %c0_i32 = arith.constant 0 : i32
    %2 = arith.minsi %1, %c0_i32 : i32
    %c0_i32_0 = arith.constant 0 : i32
    %c0_i32_1 = arith.constant 0 : i32
    return %2, %c0_i32_0 : i32, i32
  }
  func.func @transform_3(%arg0: i32, %arg1: i32) -> (i32, i32) {
    %c1_i32 = arith.constant 1 : i32
    %0 = arith.muli %arg0, %c1_i32 : i32
    %1 = arith.addi %0, %arg1 : i32
    %c0_i32 = arith.constant 0 : i32
    %2 = arith.minsi %1, %c0_i32 : i32
    %c0_i32_0 = arith.constant 0 : i32
    %c0_i32_1 = arith.constant 0 : i32
    return %2, %c0_i32_0 : i32, i32
  }
  func.func @transform_4(%arg0: i32, %arg1: i32) -> (i32, i32, i32, i32) {
    %c0_i32 = arith.constant 0 : i32
    %c0_i32_0 = arith.constant 0 : i32
    %c0_i32_1 = arith.constant 0 : i32
    %c0_i32_2 = arith.constant 0 : i32
    return %arg0, %c0_i32, %c0_i32_0, %c0_i32_1 : i32, i32, i32, i32
  }
}

</mosaic_0001>

<bundles_post_ra>
// kernel: tpu_custom_call.1
= control target key start
LH: loop header
LB: loop body
LE: loop exit
PB: predicated region body
PF: predicated region fallthrough
CT: control target
= control target key end

     0   :  { %s1492_s0 = inlined_call_operand.hbm [shape: f32[16,128], index: 0, kind: input, shape index: {}]   ;;  %s1493_s1 = inlined_call_operand.hbm [shape: f32[16,128], index: 1, kind: input, shape index: {}]   ;;  %s1494_s2 = inlined_call_operand.hbm [shape: f32[16,128], index: 2, kind: input, shape index: {}]   ;;  %s1495_s3 = inlined_call_operand.hbm [shape: f32[16,128], index: 3, kind: input, shape index: {}]   ;;  %s1496_s4 = inlined_call_operand.hbm [shape: f32[2,2,8,128], index: 4, kind: output, shape index: {}]  }
   0x1   :  { %1504 = sst [smem:[#allocation19_spill]] %s1493_s1 }
   0x2   :  { %9 = vsyncpa [#allocation3], 0 }
   0x3   :  { %11 = vsyncpa [#allocation3 + $0x1], 0 }
   0x4   :  { %12 = vsyncpa [#allocation6], 0 }
   0x5   :  { %14 = vsyncpa [#allocation6 + $0x1], 0 }
   0x6   :  { %15 = vsyncpa [#allocation9], 0 }
   0x7   :  { %17 = vsyncpa [#allocation9 + $0x1], 0 }
   0x8   :  { %18 = vsyncpa [#allocation4], 0 }
   0x9   :  { %20 = vsyncpa [#allocation4 + $0x1], 0  ;;  %s1131_s15 = smov 0   ;;  %s1133_s16 = smov 0  }
   0xa   :  { %s1135_s17 = smov 0   ;;  %s1137_s18 = smov 0  }
   0xb   :  { %s1139_s19 = smov 0   ;;  %s1141_s20 = smov 0  }
   0xc   :  { %s1143_s21 = smov 0   ;;  %s1145_s22 = smov 0  }
   0xd LB: > { %1505 = sst [smem:[#allocation15_spill]] %s1075_s17  ;;  %s1170_s23 = sadd.s32 4294967295, %s1095_s22   ;;  %s1095_s22 = sphi %s1145_s22, %s26_s22   ;;  %s1091_s21 = sphi %s1143_s21, %s1539_s21   ;;  %s1087_s20 = sphi %s1141_s20, %s1538_s20   ;;  %s1083_s19 = sphi %s1139_s19, %s1482_s19   ;;  %s1079_s18 = sphi %s1137_s18, %s1542_s18   ;;  %s1075_s17 = sphi %s1135_s17, %s1537_s17   ;;  %s1071_s16 = sphi %s1133_s16, %s1541_s16   ;;  %s1067_s15 = sphi %s1131_s15, %s1540_s15  }
   0xe   : > { %1506 = sst [smem:[#allocation16_spill]] %s1091_s21  ;;  %s698_s24 = sadd.s32 4294967294, %s1095_s22  }
   0xf   : > { %s38_s25 = sadd.s32 1, %s1091_s21  ;;  %p1064_p1 = scmp.ne.s32.totalorder %s1083_s19, 0 }
  0x10   : > { %p40_p0 = scmp.ge.s32.totalorder %s38_s25, 2  ;;  %p59_p2 = scmp.eq.s32.totalorder %s1095_s22, 0 }
  0x11   : > { %p64_p3 = scmp.ne.s32.totalorder %s1083_s19, %s1079_s18  ;;  %p65_p5 = scmp.eq.s32.totalorder %s1170_s23, 0 }
  0x12   : > { %s1544_s25 = smov (%p40_p0, %s38_s25), 0  ;;  %p1179_p4 = por %p1064_p1, %p59_p2 }
  0x13   : > { %1507 = sst [smem:[#allocation17_spill]] %s1544_s25  ;;  %p1184_p6 = por %p65_p5, %p64_p3 }
  0x14   : > { %s170_s28 = ssub.s32 %s1091_s21, %s1544_s25  ;;  %s173_s29 = sadd.s32 1, %s1075_s17 }
  0x15   : > { %s1509_s27 = scalar_select %p1184_p6, 1, 0 }
  0x16   : > { %p171_p7 = scmp.eq.s32.totalorder %s170_s28, 0  ;;  %p183_p8 = scmp.ne.s32.totalorder %s1075_s17, %s1071_s16 }
  0x17   : > { %p184_p9 = scmp.eq.s32.totalorder %s1170_s23, 1  ;;  %p189_p10 = scmp.ne.s32.totalorder %s1071_s16, %s1067_s15 }
  0x18   : > { %s1192_s30 = scalar_select %p171_p7, %s1075_s17, %s173_s29  }
  0x19   : > { %p190_p11 = scmp.eq.s32.totalorder %s698_s24, 1  ;;  %p1199_p12 = por %p184_p9, %p183_p8 }
  0x1a   : > { %1510 = sst [smem:[#allocation18_spill]] %s1192_s30  ;;  %p761_p1 = scmp.lt.s32.totalorder %s1095_s22, 2 }
  0x1b   : > { %s1511_s5 = scalar_select %p1199_p12, 1, 0 }
  0x1c   : > { %p1204_p0 = por %p190_p11, %p189_p10  ;;  %p1211_p2 = pnand %p761_p1, %p1179_p4 }
  0x1d   : > { %s234_s8 = sand.u32 1, %s1095_s22   ;;  %s1097_s9 = smov [#allocation5]  }
  0x1e   : > { %s1512_s6 = scalar_select %p1204_p0, 1, 0 }
  0x1f   : > { %s1513_s7 = scalar_select %p1211_p2, 1, 0 }
  0x20   : > { %s248_s10 = sshll.u32 %s1097_s9, 4  ;;  %s1219_s11 = scalar_lea.sflag [#allocation6], %s234_s8  ;;  %s1216_s10 = int_to_ptr.vmem [resolvable:$true] %s248_s10 }
  0x21   : > { %s1514_s1 = sld [smem:[#allocation19_spill]]  ;;  %p1229_p5 = pneg %p1211_p2 }
  0x27   : > { %s864_s14 = scalar_lea.hbm %s1514_s1, 256 }
  0x28   : > { %p865_p4 = scmp.ne.s32.totalorder %s1514_s1, %s864_s14  ;;  %p871_p9 = scmp.lt.u32.totalorder %s864_s14, %s864_s14 }
  0x29   : > { %p873_p10 = scmp.lt.u32.totalorder %s864_s14, %s1514_s1 }
  0x2a   : > { %p867_p7 = pnand %p1229_p5, %p865_p4 }
  0x2b   : > { %p874_p11 = por %p873_p10, %p871_p9 }
  0x2c   : > { %p868_p8 = pneg %p867_p7 }
  0x2e   : > { %p875_p1 = pnand %p874_p11, %p868_p8 }
  0x30   : > { %878 = shalt.err (!%p875_p1)
}
  0x31   : > { %s879_s8 = scalar_lea.vmem %s1216_s10, 256  ;;  %s886_s9 = scalar_lea.vmem %s1216_s10, 512 }
  0x32   : > { %p880_p13 = scmp.ne.s32.totalorder %s1216_s10, %s879_s8  ;;  %p887_p4 = scmp.lt.s32.totalorder %s1216_s10, %s1216_s10 }
  0x33   : > { %p888_p7 = scmp.lt.s32.totalorder %s886_s9, %s879_s8 }
  0x34   : > { %p882_p3 = pnand %p880_p13, %p1229_p5 }
  0x35   : > { %p889_p12 = por %p888_p7, %p887_p4 }
  0x36   : > { %p883_p0 = pneg %p882_p3 }
  0x38   : > { %p890_p6 = pnand %p889_p12, %p883_p0 }
  0x3a   : > { %893 = shalt.err (!%p890_p6)
}
  0x3b   : > { %s1098_s12 = smov 128   ;;  %s1099_s13 = smov 8  }
  0x3c   : > { %750 = dma.hbm_to_vmem [thread:$0]  (!%p1211_p2), %s1514_s1, 256, %s1216_s10, %s1219_s11, %s1098_s12, %s1098_s12, %s1099_s13  }
  0x3d   : > { %p304_p13 = scmp.lt.s32.totalorder %s1095_s22, 3  ;;  %p1516_p3 = scmp.ge.s32.totalorder %s1095_s22, 1 }
  0x3e   : > { %s1100_s28 = smov [#allocation2]   ;;  %s894_s25 = scalar_lea.hbm %s1492_s0, 256 }
  0x3f   : > { %p1258_p12 = pnand %p1516_p3, %p304_p13  ;;  %s224_s29 = sshll.u32 %s1100_s28, 4  ;;  %s225_s29 = int_to_ptr.vmem [resolvable:$true] %s224_s29 }
  0x40   : > { %p895_p6 = scmp.ne.s32.totalorder %s1492_s0, %s894_s25  ;;  %p901_p9 = scmp.lt.u32.totalorder %s894_s25, %s894_s25 }
  0x41   : > { %s1517_s24 = scalar_select %p1258_p12, 1, 0 }
  0x42   : > { %p897_p0 = pnand %p895_p6, %p1229_p5  ;;  %p903_p10 = scmp.lt.u32.totalorder %s894_s25, %s1492_s0 }
  0x44   : > { %p898_p8 = pneg %p897_p0  ;;  %p904_p11 = por %p903_p10, %p901_p9 }
  0x46   : > { %p905_p1 = pnand %p904_p11, %p898_p8 }
  0x48   : > { %908 = shalt.err (!%p905_p1)
}
  0x49   : > { %s909_s18 = scalar_lea.vmem %s225_s29, 256  ;;  %s916_s28 = scalar_lea.vmem %s225_s29, 512 }
  0x4a   : > { %p910_p4 = scmp.ne.s32.totalorder %s225_s29, %s909_s18  ;;  %p917_p3 = scmp.lt.s32.totalorder %s225_s29, %s225_s29 }
  0x4b   : > { %p918_p12 = scmp.lt.s32.totalorder %s916_s28, %s909_s18 }
  0x4c   : > { %p912_p7 = pnand %p910_p4, %p1229_p5 }
  0x4d   : > { %p919_p2 = por %p918_p12, %p917_p3 }
  0x4e   : > { %p913_p13 = pneg %p912_p7 }
  0x50   : > { %p920_p6 = pnand %p919_p2, %p913_p13 }
  0x52   : > { %923 = shalt.err (!%p920_p6)
}
  0x53   : > { %p1518_p0 = scmp.ne.s32.totalorder %s1513_s7, 0  ;;  %s1101_s30 = smov [#allocation7]  }
  0x54   : > { %s272_s8 = sshll.u32 %s1101_s30, 4  ;;  %s924_s14 = scalar_lea.hbm %s1494_s2, 256  ;;  %s273_s8 = int_to_ptr.vmem [resolvable:$true] %s272_s8 }
  0x55   : > { %747 = dma.hbm_to_vmem [thread:$0]  (!%p1518_p0), %s1492_s0, 256, %s225_s29, [#allocation3], %s1098_s12, %s1098_s12, %s1099_s13  }
  0x56   : > { %p925_p2 = scmp.ne.s32.totalorder %s1494_s2, %s924_s14  ;;  %p931_p9 = scmp.lt.u32.totalorder %s924_s14, %s924_s14 }
  0x57   : > { %p933_p10 = scmp.lt.u32.totalorder %s924_s14, %s1494_s2 }
  0x58   : > { %p927_p12 = pnand %p925_p2, %p1229_p5 }
  0x59   : > { %p934_p11 = por %p933_p10, %p931_p9 }
  0x5a   : > { %p928_p8 = pneg %p927_p12 }
  0x5c   : > { %p935_p1 = pnand %p934_p11, %p928_p8 }
  0x5e   : > { %938 = shalt.err (!%p935_p1)
}
  0x5f   : > { %s939_s29 = scalar_lea.vmem %s273_s8, 256  ;;  %s946_s21 = scalar_lea.vmem %s273_s8, 512 }
  0x60   : > { %p940_p4 = scmp.ne.s32.totalorder %s273_s8, %s939_s29  ;;  %p947_p3 = scmp.lt.s32.totalorder %s273_s8, %s273_s8 }
  0x61   : > { %p948_p6 = scmp.lt.s32.totalorder %s946_s21, %s939_s29 }
  0x62   : > { %p942_p7 = pnand %p940_p4, %p1229_p5 }
  0x63   : > { %p949_p0 = por %p948_p6, %p947_p3 }
  0x64   : > { %p943_p13 = pneg %p942_p7 }
  0x66   : > { %p950_p2 = pnand %p949_p0, %p943_p13 }
  0x68   : > { %953 = shalt.err (!%p950_p2)
}
  0x69   : > { %p1519_p12 = scmp.ne.s32.totalorder %s1513_s7, 0  ;;  %s1102_s25 = smov [#allocation8]  }
  0x6a   : > { %s296_s30 = sshll.u32 %s1102_s25, 4  ;;  %s954_s14 = scalar_lea.hbm %s1495_s3, 256  ;;  %s297_s30 = int_to_ptr.vmem [resolvable:$true] %s296_s30 }
  0x6b   : > { %753 = dma.hbm_to_vmem [thread:$0]  (!%p1519_p12), %s1494_s2, 256, %s273_s8, %s1219_s11, %s1098_s12, %s1098_s12, %s1099_s13  }
  0x6c   : > { %p955_p0 = scmp.ne.s32.totalorder %s1495_s3, %s954_s14  ;;  %p961_p10 = scmp.lt.u32.totalorder %s954_s14, %s954_s14 }
  0x6d   : > { %p963_p11 = scmp.lt.u32.totalorder %s954_s14, %s1495_s3 }
  0x6e   : > { %p957_p8 = pnand %p955_p0, %p1229_p5 }
  0x6f   : > { %p964_p1 = por %p963_p11, %p961_p10 }
  0x70   : > { %p958_p9 = pneg %p957_p8 }
  0x72   : > { %p965_p4 = pnand %p964_p1, %p958_p9 }
  0x74   : > { %968 = shalt.err (!%p965_p4)
}
  0x75   : > { %s969_s11 = scalar_lea.vmem %s297_s30, 256  ;;  %s976_s8 = scalar_lea.vmem %s297_s30, 512 }
  0x76   : > { %p970_p7 = scmp.ne.s32.totalorder %s297_s30, %s969_s11  ;;  %p977_p6 = scmp.lt.s32.totalorder %s297_s30, %s297_s30 }
  0x77   : > { %p978_p2 = scmp.lt.s32.totalorder %s976_s8, %s969_s11 }
  0x78   : > { %p972_p13 = pnand %p970_p7, %p1229_p5 }
  0x79   : > { %p979_p12 = por %p978_p2, %p977_p6 }
  0x7a   : > { %p973_p3 = pneg %p972_p13 }
  0x7c   : > { %p980_p0 = pnand %p979_p12, %p973_p3 }
  0x7e   : > { %983 = shalt.err (!%p980_p0)
}
  0x7f   : > { %p1520_p8 = scmp.ne.s32.totalorder %s1513_s7, 0  ;;  %p1521_p9 = scmp.ne.s32.totalorder %s1517_s24, 0 }
  0x80   : > { %s310_s26 = sand.u32 (!%p1521_p9), 1, %s1083_s19   ;;  %p1522_p5 = scmp.ne.s32.totalorder (!%p1521_p9), %s1509_s27, 0 }
  0x81   : > { %756 = dma.hbm_to_vmem [thread:$0]  (!%p1520_p8), %s1495_s3, 256, %s297_s30, [#allocation9], %s1098_s12, %s1098_s12, %s1099_s13  }
  0x82   : > { %308 = sbr.rel (%p1521_p9) target bundleno = 207 (0xcf), region = 36  ;;  %s1329_s25 = sshll.u32 (!%p1521_p9), %s310_s26, 4 }
  0x83   : > { %s311_s9 = scalar_lea.sflag (!%p1521_p9), [#allocation3], %s310_s26  ;;  %s314_s10 = scalar_lea.vmem (!%p1521_p9), [#allocation2], %s1329_s25 }
  0x89   : > { %1049 = dma.done.wait (%p1522_p5), %s311_s9, 256  }
  0x8a   : > { %1051 = vsyncadd (%p1522_p5), %s311_s9, 4294967040  ;;  %s319_s7 = sand.u32 1, %s1170_s23   ;;  %s323_s13 = scalar_lea.vmem [#allocation5], %s1329_s25 }
  0x8b   : > { %s320_s12 = scalar_lea.sflag [#allocation6], %s319_s7 }
  0x8c   : > { %1053 = dma.done.wait (%p1522_p5), %s320_s12, 512  }
  0x8d   : > { %1055 = vsyncadd (%p1522_p5), %s320_s12, 4294966784  ;;  %s332_s24 = scalar_lea.vmem [#allocation7], %s1329_s25  ;;  %s338_s30 = scalar_lea.sflag [#allocation9], %s310_s26 }
  0x8e   : > { %s341_s14 = scalar_lea.vmem [#allocation8], %s1329_s25 }
  0x8f   : > { %1057 = dma.done.wait (%p1522_p5), %s338_s30, 256  }
  0x90   : > { %1059 = vsyncadd (%p1522_p5), %s338_s30, 4294967040  ;;  %v412_v0 = vld [vmem:[%s314_s10] sm:$0xff]  ;;  %v413_v1 = vld [vmem:[%s314_s10 + $0x8] sm:$0xff]  ;;  %v406_v29 = vlaneseq  ;;  %s719_s23 = sshll.u32 %s1087_s20, 4  ;;  %s378_s18 = sand.u32 1, %s1071_s16  }
  0x91   : > { %v1348_v2 = vclamps-f32 %v412_v0, 100.0  ;;  %v1350_v3 = vclamps-f32 %v413_v1, 100.0  ;;  %v471_v4 = vld [vmem:[%s323_s13] sm:$0xff]  ;;  %v472_v5 = vld [vmem:[%s323_s13 + $0x8] sm:$0xff]  ;;  %s1361_s27 = ssub.s32 16, %s719_s23  ;;  %s718_s28 = sshll.u32 %s378_s18, 4 }
  0x92   : > { %v1352_v6 = vclamps-f32 %v471_v4, 100.0  ;;  %v1354_v7 = vclamps-f32 %v472_v5, 100.0  ;;  %v414_v10 = vld [vmem:[%s332_s24] sm:$0xff]  ;;  %v415_v15 = vld [vmem:[%s332_s24 + $0x8] sm:$0xff]  ;;  %v407_v36 = vshrl.u32 %v406_v29, 7  ;;  %v409_v44 = vstv %s1361_s27  ;;  %s733_s29 = sshll.u32 %s1087_s20, 8 }
  0x93   : > { %v434_v8 = vand.u32 2147483647, %v1348_v2  ;;  %v435_v9 = vand.u32 2147483647, %v1350_v3  ;;  %v416_v16 = vmul.f32 0.5, %v414_v10  ;;  %v473_v21 = vld [vmem:[%s341_s14] sm:$0xff]  ;;  %vm430_vm0 = vcmp.ne.f32.partialorder %v1348_v2, %v1348_v2  ;;  %s1434_s17 = scalar_lea.hbm %s1496_s4, %s733_s29 }
  0x94   : > { %v493_v13 = vand.u32 2147483647, %v1352_v6  ;;  %v494_v14 = vand.u32 2147483647, %v1354_v7  ;;  %v417_v22 = vmul.f32 0.5, %v415_v15  ;;  %v474_v23 = vld [vmem:[%s341_s14 + $0x8] sm:$0xff]  ;;  %vm1368_vm1 = vcmp.lt.s32.totalorder %v407_v36, %v409_v44 }
  0x95   : > { %v436_v11 = vsub.f32 0.0, %v434_v8  ;;  %v437_v12 = vsub.f32 0.0, %v435_v9  ;;  %v475_v26 = vmul.f32 0.5, %v473_v21  ;;  %v476_v27 = vmul.f32 0.5, %v474_v23  ;;  %s380_s21 = scalar_lea.vmem [#allocation10], %s718_s28  ;;  %s1440_s20 = scalar_lea.sflag [#allocation4], %s378_s18 }
  0x96   : > { %v495_v19 = vsub.f32 0.0, %v493_v13  ;;  %v496_v20 = vsub.f32 0.0, %v494_v14  ;;  %v408_v47 = vadd.s32 8, %v407_v36  ;;  %v428_v51 = vmax.f32 %v1348_v2, 0.0  ;;  %s550_s11 = sshll.u32 %s380_s21, 4  ;;  %p1533_p10 = scmp.ne.s32.totalorder %s1511_s5, 0  ;;  %s1436_s11 = int_to_ptr.vmem [resolvable:$true] %s550_s11 }
  0x97   : > { %v438_v17 = vmul.f32 1.442695, %v436_v11  ;;  %v440_v18 = vmul.f32 1.442695, %v437_v12  ;;  %v429_v55 = vmax.f32 %v1350_v3, 0.0  ;;  %vm431_vm2 = vcmp.ne.f32.partialorder %v1350_v3, %v1350_v3  ;;  %s984_s26 = scalar_lea.vmem %s1436_s11, 256 }
  0x98   : > { %v497_v24 = vmul.f32 1.442695, %v495_v19  ;;  %v499_v25 = vmul.f32 1.442695, %v496_v20  ;;  %vm1374_vm3 = vcmp.lt.s32.totalorder %v408_v47, %v409_v44  ;;  %v487_v9 = vmax.f32 %v1352_v6, 0.0  ;;  %p985_p12 = scmp.ne.s32.totalorder %s1436_s11, %s984_s26  ;;  %s1103_s25 = smov [#allocation10]  }
  0x99   : > { %840 = vpow2.f32 %v438_v17  ;;  %v488_v15 = vmax.f32 %v1354_v7, 0.0  ;;  %vm489_vm8 = vcmp.ne.f32.partialorder %v1352_v6, %v1352_v6  ;;  %vm490_vm9 = vcmp.ne.f32.partialorder %v1354_v7, %v1354_v7  ;;  %s988_s9 = sshll.u32 %s1103_s25, 4  ;;  %s989_s9 = int_to_ptr.vmem [resolvable:$false] %s988_s9 }
  0x9a   : > { %842 = vpow2.f32 %v440_v18  ;;  %p986_p11 = pnand %p985_p12, %p1533_p10  ;;  %s990_s10 = scalar_lea.vmem %s989_s9, 512 }
  0x9b   : > { %844 = vtanh.f32 %v416_v16  ;;  %p991_p4 = scmp.lt.s32.totalorder %s1436_s11, %s989_s9  ;;  %p992_p7 = scmp.lt.s32.totalorder %s990_s10, %s984_s26 }
  0x9c   : > { %846 = vpow2.f32 %v497_v24  ;;  %p987_p1 = pneg %p986_p11 }
  0x9d   : > { %848 = vpow2.f32 %v499_v25  ;;  %p993_p13 = por %p992_p7, %p991_p4 }
  0x9e   : > { %850 = vtanh.f32 %v417_v22 }
  0x9f   : > { %852 = vtanh.f32 %v475_v26  ;;  %p994_p3 = pnand %p993_p13, %p987_p1 }
  0xa0   : > { %854 = vtanh.f32 %v476_v27 }
  0xa3   : > { %v841_v28 = vpop.eup %840 }
  0xa4   : > { %v843_v30 = vpop.eup %842  ;;  %v442_v31 = vadd.f32 1.0, %v841_v28  ;;  %v445_v37 = vmul.f32 -0.5, %v841_v28  ;;  %v448_v52 = vand.u32 2147483647, %v841_v28 }
  0xa5   : > { %v845_v32 = vpop.eup %844  ;;  %v451_v33 = vadd.f32 1.0, %v843_v30  ;;  %v454_v40 = vmul.f32 -0.5, %v843_v30  ;;  %v457_v56 = vand.u32 2147483647, %v843_v30 }
  0xa6   : > { %v847_v34 = vpop.eup %846  ;;  %856 = vlog2.f32 %v442_v31  ;;  %v420_v42 = vmul.f32 0.5, %v845_v32  ;;  %v446_v49 = vadd.f32 1.0, %v445_v37  ;;  %vm1378_vm4 = vcmp.lt.f32.partialorder %v448_v52, 0.0004427343 }
  0xa7   : > { %v849_v35 = vpop.eup %848  ;;  %858 = vlog2.f32 %v451_v33  ;;  %v501_v38 = vadd.f32 1.0, %v847_v34  ;;  %v504_v45 = vmul.f32 -0.5, %v847_v34  ;;  %v455_v53 = vadd.f32 1.0, %v454_v40 }
  0xa8   : > { %v851_v39 = vpop.eup %850  ;;  %v510_v41 = vadd.f32 1.0, %v849_v35  ;;  %v513_v50 = vmul.f32 -0.5, %v849_v35  ;;  %v422_v54 = vadd.f32 0.5, %v420_v42  ;;  %v447_v63 = vmul.f32 %v841_v28, %v446_v49 }
  0xa9   : > { %860 = vlog2.f32 %v501_v38  ;;  %v853_v43 = vpop.eup %852  ;;  %v421_v48 = vmul.f32 0.5, %v851_v39  ;;  %v505_v60 = vadd.f32 1.0, %v504_v45  ;;  %v507_v0 = vand.u32 2147483647, %v847_v34 }
  0xaa   : > { %862 = vlog2.f32 %v510_v41  ;;  %v855_v46 = vpop.eup %854  ;;  %v479_v58 = vmul.f32 0.5, %v853_v43  ;;  %v514_v1 = vadd.f32 1.0, %v513_v50  ;;  %v456_v8 = vmul.f32 %v843_v30, %v455_v53 }
  0xab   : > { %v480_v59 = vmul.f32 0.5, %v855_v46  ;;  %v423_v62 = vadd.f32 0.5, %v421_v48  ;;  %v516_v10 = vand.u32 2147483647, %v849_v35  ;;  %vm1383_vm5 = vcmp.lt.f32.partialorder %v457_v56, 0.0004427343 }
  0xac   : > { %v464_v14 = vmul.f32 %v1348_v2, %v422_v54  ;;  %v481_v17 = vadd.f32 0.5, %v479_v58  ;;  %v506_v19 = vmul.f32 %v847_v34, %v505_v60  ;;  %vm1393_vm6 = vcmp.lt.f32.partialorder %v507_v0, 0.0004427343 }
  0xad   : > { %v482_v18 = vadd.f32 0.5, %v480_v59  ;;  %v465_v22 = vmul.f32 %v1350_v3, %v423_v62  ;;  %v515_v24 = vmul.f32 %v849_v35, %v514_v1  ;;  %vm517_vm7 = vcmp.lt.f32.partialorder %v516_v10, 0.0004427343 }
  0xae   : > { %v523_v33 = vmul.f32 %v1352_v6, %v481_v17 }
  0xaf   : > { %v524_v34 = vmul.f32 %v1354_v7, %v482_v18 }
  0xb0   : > { %v857_v4 = vpop.eup %856 }
  0xb1   : > { %v859_v11 = vpop.eup %858  ;;  %v444_v12 = vmul.f32 0.6931472, %v857_v4 }
  0xb2   : > { %v453_v16 = vmul.f32 0.6931472, %v859_v11 }
  0xb3   : > { %v861_v20 = vpop.eup %860  ;;  %v450_v21 = vsel %vm1378_vm4, %v447_v63, %v444_v12 }
  0xb4   : > { %v863_v25 = vpop.eup %862  ;;  %v459_v26 = vsel %vm1383_vm5, %v456_v8, %v453_v16  ;;  %v460_v27 = vadd.f32 %v450_v21, %v428_v51  ;;  %v503_v28 = vmul.f32 0.6931472, %v861_v20 }
  0xb5   : > { %v461_v29 = vadd.f32 %v459_v26, %v429_v55  ;;  %v512_v30 = vmul.f32 0.6931472, %v863_v25 }
  0xb6   : > { %v462_v31 = vsel %vm430_vm0, %v1348_v2, %v460_v27  ;;  %v509_v32 = vsel %vm1393_vm6, %v506_v19, %v503_v28 }
  0xb7   : > { %v463_v35 = vsel %vm431_vm2, %v1350_v3, %v461_v29  ;;  %v466_v36 = vsub.f32 %v462_v31, %v464_v14  ;;  %v518_v37 = vsel %vm517_vm7, %v515_v24, %v512_v30  ;;  %v519_v38 = vadd.f32 %v509_v32, %v487_v9 }
  0xb8   : > { %v467_v39 = vsub.f32 %v463_v35, %v465_v22  ;;  %v520_v40 = vadd.f32 %v518_v37, %v488_v15 }
  0xb9   : > { %v468_v2 = vsel %vm1368_vm1, %v466_v36, 0.0  ;;  %v521_v41 = vsel %vm489_vm8, %v1352_v6, %v519_v38 }
  0xba   : > { %v469_v42 = vsel %vm1374_vm3, %v467_v39, 0.0  ;;  %v522_v43 = vsel %vm490_vm9, %v1354_v7, %v520_v40  ;;  %v525_v3 = vsub.f32 %v521_v41, %v523_v33 }
  0xbb   : > { %v470_v44 = vadd.f32 %v469_v42, %v468_v2  ;;  %v526_v45 = vsub.f32 %v522_v43, %v524_v34 }
  0xbc   : > { %v527_v46 = vsel %vm1368_vm1, %v525_v3, 0.0 }
  0xbd   : > { %v528_v6 = vsel %vm1374_vm3, %v526_v45, 0.0  ;;  %534 = vst [vmem:[%s380_s21] sm:$0xff] %v470_v44 }
  0xbe   : > { %v529_v47 = vadd.f32 %v528_v6, %v527_v46 }
  0xc0   : > { %535 = vst [vmem:[%s380_s21 + $0x8] sm:$0xff] %v529_v47 }
  0xc1   : > { %997 = shalt.err (!%p994_p3)
}
  0xc2   : > { %s998_s7 = scalar_lea.hbm %s1434_s17, 256  ;;  %s1002_s24 = scalar_lea.hbm %s1496_s4, 512 }
  0xc3   : > { %p999_p6 = scmp.ne.s32.totalorder %s1434_s17, %s998_s7  ;;  %p1003_p8 = scmp.lt.u32.totalorder %s1434_s17, %s1496_s4 }
  0xc4   : > { %p1004_p9 = scmp.lt.u32.totalorder %s1002_s24, %s998_s7  ;;  %p1006_p12 = scmp.lt.u32.totalorder %s998_s7, %s1434_s17 }
  0xc5   : > { %p1000_p2 = pnand %p999_p6, %p1533_p10 }
  0xc6   : > { %p1005_p5 = por %p1004_p9, %p1003_p8 }
  0xc7   : > { %p1001_p0 = pneg %p1000_p2 }
  0xc8   : > { %p1007_p11 = por %p1006_p12, %p1005_p5 }
  0xca   : > { %p1008_p1 = pnand %p1007_p11, %p1001_p0 }
  0xcc   : > { %1011 = shalt.err (!%p1008_p1)
}
  0xcd   : > { %s1104_s23 = smov 128   ;;  %s1105_s27 = smov 8  }
  0xce   : > { %742 = dma.vmem_to_hbm [thread:$0]  (%p1533_p10), %s1436_s11, 256, %s1434_s17, %s1440_s20, %s1104_s23, %s1104_s23, %s1105_s27  }
  0xcf PF: > { %s565_s18 = sand.u32 1, %s1067_s15   ;;  %p1534_p4 = scmp.ne.s32.totalorder %s1512_s6, 0 }
  0xd0   : > { %p1535_p7 = scmp.ge.s32.totalorder %s1095_s22, 2  ;;  %s566_s28 = scalar_lea.sflag [#allocation4], %s565_s18 }
  0xd2   : > { %p758_p13 = pnand %p1535_p7, %p1534_p4 }
  0xd4   : > { %1061 = dma.done.wait (!%p758_p13), %s566_s28, 256  }
  0xd5   : > { %1063 = vsyncadd (!%p758_p13), %s566_s28, 4294967040  ;;  %s26_s22 = sadd.s32 1, %s1095_s22   ;;  %s1536_s29 = sld [smem:[#allocation15_spill]] }
  0xd6   : > { %p23_p3 = scmp.ge.s32.totalorder %s26_s22, 4   ;;  %s1537_s17 = sld [smem:[#allocation18_spill]] }
  0xd7   : > { %s1538_s20 = sld [smem:[#allocation16_spill]]  ;;  %s1539_s21 = sld [smem:[#allocation17_spill]] }
  0xd8   : > { %s1540_s15 = smov %s1071_s16  ;;  %s1542_s18 = smov %s1083_s19 }
  0xd9   : > { %s1482_s19 = smov 0   ;;  %25 = sbr.rel (!%p23_p3) target bundleno = 13 (0xd), region = 122 }
  0xdb   : > { %s1541_s16 = smov %s1536_s29 }
  0xe0   :  { %571 = vsyncpa [#allocation3], 1 }
  0xe1   :  { %573 = vsyncpa [#allocation3 + $0x1], 1 }
  0xe2   :  { %574 = vsyncpa [#allocation6], 1 }
  0xe3   :  { %576 = vsyncpa [#allocation6 + $0x1], 1 }
  0xe4   :  { %577 = vsyncpa [#allocation9], 1 }
  0xe5   :  { %579 = vsyncpa [#allocation9 + $0x1], 1 }
  0xe6   :  { %580 = vsyncpa [#allocation4], 1 }
  0xe7   :  { %582 = vsyncpa [#allocation4 + $0x1], 1 }

</bundles_post_ra>
